<compile_context>
chip_gen: v6e
topology: v6e:2x2x1
jax: 0.10.0
libtpu: 0.0.40
codegen_flags: <defaults>
</compile_context>

<pallas_src>
import functools

import jax
import jax.numpy as jnp
import numpy as np
from jax.experimental import pallas as pl
from jax.experimental.pallas import tpu as pltpu


# -----------------------------------------------------------------------------
# Pallas kernel: out[b, :, tile] = weights @ x_rec[b, :, tile] (+ bias)
# -----------------------------------------------------------------------------
def _abc_matmul_kernel(if_bias, w_ref, b_ref, x_ref, o_ref):
    # w_ref: (P, CK)    resident weights
    # b_ref: (P, 1)     resident bias
    # x_ref: (CK, TN)   pixel tile of the reconstructed image (batch squeezed)
    # o_ref: (P, TN)    output tile (batch squeezed)
    acc = jnp.dot(w_ref[...], x_ref[...], preferred_element_type=jnp.float32)
    if if_bias:
        acc = acc + b_ref[...]          # (P, 1) broadcasts over the pixel tile
    o_ref[...] = acc.astype(o_ref.dtype)


def abc_matmul(weights, bias, x_rec, *, if_bias, tile_n=1024):
    """x_rec: (B, C*K, N) -> (B, P, N).  Memory-bound skinny GEMM."""
    P, CK = weights.shape
    B, CK2, N = x_rec.shape
    assert CK == CK2, "reconstructed matrix row dim must be C*K"

    # Lane-dense tile: multiple of 128, no larger than padded N.
    n_pad128 = pl.cdiv(N, 128) * 128
    tile_n = max(128, (min(tile_n, n_pad128) // 128) * 128)
    n_tiles = pl.cdiv(N, tile_n)
    N_pad = n_tiles * tile_n
    if N_pad != N:
        x_rec = jnp.pad(x_rec, ((0, 0), (0, 0), (0, N_pad - N)))

    itemsize = jnp.dtype(x_rec.dtype).itemsize
    w_itemsize = jnp.dtype(weights.dtype).itemsize
    # Resident weights/bias + double-buffered input and output tiles.
    vmem_need = ((P * CK + P) * w_itemsize
                 + 2 * (CK + P) * tile_n * itemsize)
    vmem_limit = int(min(max(4 * vmem_need, 32 * 1024 * 1024), 64 * 1024 * 1024))

    cost = pl.CostEstimate(
        flops=2 * P * CK * B * N_pad,
        transcendentals=0,
        bytes_accessed=itemsize * B * N_pad * (CK + P) + w_itemsize * (P * CK + P),
    )

    kernel = functools.partial(_abc_matmul_kernel, if_bias)
    out = pl.pallas_call(
        kernel,
        out_shape=jax.ShapeDtypeStruct((B, P, N_pad), x_rec.dtype),
        grid_spec=pltpu.PrefetchScalarGridSpec(
            num_scalar_prefetch=0,
            grid=(B, n_tiles),
            in_specs=[
                pl.BlockSpec((P, CK), lambda b, j: (0, 0)),            # weights
                pl.BlockSpec((P, 1), lambda b, j: (0, 0)),             # bias
                pl.BlockSpec((None, CK, tile_n), lambda b, j: (b, 0, j)),  # x_rec
            ],
            out_specs=pl.BlockSpec((None, P, tile_n), lambda b, j: (b, 0, j)),
        ),
        compiler_params=pltpu.CompilerParams(
            dimension_semantics=("parallel", "parallel"),
            vmem_limit_bytes=vmem_limit,
        ),
        cost_estimate=cost,
    )(weights, bias, x_rec)

    if N_pad != N:
        out = out[:, :, :N]
    return out


# -----------------------------------------------------------------------------
# Precompute (hoisted out of the forward): hashtable argsort -> spatial index.
# -----------------------------------------------------------------------------
def precompute_spatial_index(hashtable, in_channel, kernel_size):
    """Equivalent of _build_full_hash reduced to per-channel spatial indices.

    Returns int32 indices of shape (C, K, H*W): for output pixel p of channel c,
    the K source pixels (flat H*W indices) inside the same channel of the same
    batch element — the per-batch / per-channel offsets of the PyTorch flat
    index factor out exactly.
    """
    HC, HH, HW, HHW = hashtable.shape
    if in_channel % HC != 0:
        raise ValueError("in_channel must be divisible by hash channel dim")
    if HH * HW != HHW:
        raise ValueError("last hash dim must equal H*W")
    if HHW < kernel_size:
        raise ValueError("kernel_size must be <= H*W")
    # Descending argsort, keep top-K indices (tie-breaking may differ from torch).
    idx = jnp.argsort(-hashtable, axis=-1)[..., :kernel_size]   # (HC, H, W, K)
    idx = idx.reshape(HC, HH * HW, kernel_size)                 # (HC, HW, K)
    idx = jnp.transpose(idx, (0, 2, 1))                         # (HC, K, HW)
    reps = in_channel // HC
    idx = jnp.tile(idx, (reps, 1, 1))                           # (C, K, HW)
    return idx.astype(jnp.int32)


def img_reconstruction(x, spatial_idx):
    """x: (B, C, H, W); spatial_idx: (C, K, H*W) -> (B, C*K, H*W) (no transpose)."""
    B, C, H, W = x.shape
    K = spatial_idx.shape[1]
    x_flat = x.reshape(B, C, H * W)
    # gathered[b, c, k, p] = x[b, c, spatial_idx[c, k, p]]
    gather_c = jax.vmap(lambda row, ind: jnp.take(row, ind, axis=0),
                        in_axes=(0, 0))                          # over channels
    gathered = jax.vmap(lambda xf: gather_c(xf, spatial_idx))(x_flat)  # (B,C,K,HW)
    return gathered.reshape(B, C * K, H * W)


def abc_2d_agnostic_forward(x, spatial_idx, weights, bias, *,
                            if_bias=False, tile_n=1024):
    B, C, H, W = x.shape
    P = weights.shape[0]
    x_rec = img_reconstruction(x, spatial_idx)                   # (B, C*K, H*W)
    out = abc_matmul(weights, bias, x_rec, if_bias=if_bias, tile_n=tile_n)
    return out.reshape(B, P, H, W)                               # free reshape


# -----------------------------------------------------------------------------
# Demo / self-check
# -----------------------------------------------------------------------------
if __name__ == "__main__":
    B, C, H, W = 2, 4, 16, 16          # input NCHW
    K = 4                              # kernel_size (taps per pixel)
    P = 8                              # kernel_number_per_pixel
    HC = 2                             # hash channel dim (C % HC == 0)

    key = jax.random.PRNGKey(0)
    k1, k2, k3, k4 = jax.random.split(key, 4)

    x = jax.random.normal(k1, (B, C, H, W), dtype=jnp.float32)
    hashtable = jax.random.uniform(k2, (HC, H, W, H * W), dtype=jnp.float32)

    bound = float(np.sqrt(1.0 / C / K))
    weights = jax.random.uniform(k3, (P, C * K), minval=-bound, maxval=bound,
                                 dtype=jnp.float32)
    bias = jax.random.uniform(k4, (P, 1), minval=-bound, maxval=bound,
                              dtype=jnp.float32)

    # Hoisted out of the forward: compute once per layer, reuse every call.
    spatial_idx = jax.block_until_ready(
        precompute_spatial_index(hashtable, C, K))

    forward = jax.jit(functools.partial(abc_2d_agnostic_forward,
                                        if_bias=True, tile_n=1024))
    out = forward(x, spatial_idx, weights, bias)
    out = jax.block_until_ready(out)
    assert out.shape == (B, P, H, W)

    # Pure-JAX reference mirroring the PyTorch (C*K, B*H*W) formulation.
    idx_ref = jnp.argsort(-hashtable, axis=-1)[..., :K]          # (HC, H, W, K)
    idx_ref = jnp.tile(idx_ref, (C // HC, 1, 1, 1))              # (C, H, W, K)
    x_flat = x.reshape(B, C, H * W)
    gathered = jax.vmap(lambda xf: jnp.take_along_axis(
        xf, idx_ref.reshape(C, H * W * K), axis=1))(x_flat)
    gathered = gathered.reshape(B, C, H, W, K)
    x_mat_ref = jnp.transpose(gathered, (1, 4, 0, 2, 3)).reshape(C * K, B * H * W)
    out_ref = (weights @ x_mat_ref + bias).reshape(P, B, H, W)
    out_ref = jnp.transpose(out_ref, (1, 0, 2, 3))

    np.testing.assert_allclose(np.asarray(out), np.asarray(out_ref),
                               rtol=1e-5, atol=1e-5)

    print("KERNEL_OK")
</pallas_src>

<mosaic_0001>
module attributes {stable_mosaic.version = 11 : i64} {
  func.func @_abc_matmul_kernel(%arg0: i32, %arg1: i32, %arg2: memref<8x16xf32, #tpu.memory_space<vmem>>, %arg3: memref<8x1xf32, #tpu.memory_space<vmem>>, %arg4: memref<1x16x256xf32, #tpu.memory_space<vmem>>, %arg5: memref<1x8x256xf32, #tpu.memory_space<vmem>>) attributes {dimension_semantics = [#tpu.dimension_semantics<parallel>, #tpu.dimension_semantics<parallel>], iteration_bounds = array<i64: 2, 1>, scalar_prefetch = 0 : i64, scratch_operands = 0 : i64, tpu.core_type = #tpu.core_type<tc>, window_params = [{pipeline_mode = #tpu.pipeline_mode<synchronous>, transform_indices = @transform_0, window_bounds = array<i64: 8, 16>}, {pipeline_mode = #tpu.pipeline_mode<synchronous>, transform_indices = @transform_1, window_bounds = array<i64: 8, 1>}, {transform_indices = @transform_2, window_bounds = array<i64: 1, 16, 256>}, {transform_indices = @transform_3, window_bounds = array<i64: 1, 8, 256>}]} {
    %c0 = arith.constant 0 : index
    %c0_0 = arith.constant 0 : index
    %0 = vector.load %arg2[%c0, %c0_0] : memref<8x16xf32, #tpu.memory_space<vmem>>, vector<8x16xf32>
    %c0_1 = arith.constant 0 : index
    %c0_2 = arith.constant 0 : index
    %c0_3 = arith.constant 0 : index
    %1 = vector.load %arg4[%c0_1, %c0_2, %c0_3] : memref<1x16x256xf32, #tpu.memory_space<vmem>>, vector<1x16x256xf32>
    %2 = vector.shape_cast %1 : vector<1x16x256xf32> to vector<16x256xf32>
    %cst = arith.constant dense<0.000000e+00> : vector<8x256xf32>
    %3 = tpu.matmul %0, %2, %cst {dimension_numbers = #tpu.dot_dimension_numbers<[1], [0], [0], [1], [0, 0, 1, 1], [], []>} : vector<8x16xf32>, vector<16x256xf32>, vector<8x256xf32> -> vector<8x256xf32>
    %c0_4 = arith.constant 0 : index
    %c0_5 = arith.constant 0 : index
    %4 = vector.load %arg3[%c0_4, %c0_5] : memref<8x1xf32, #tpu.memory_space<vmem>>, vector<8x1xf32>
    %5 = vector.broadcast %4 : vector<8x1xf32> to vector<8x256xf32>
    %6 = arith.addf %3, %5 : vector<8x256xf32>
    %c0_6 = arith.constant 0 : index
    %c0_7 = arith.constant 0 : index
    %c0_8 = arith.constant 0 : index
    %7 = vector.load %arg5[%c0_6, %c0_7, %c0_8] : memref<1x8x256xf32, #tpu.memory_space<vmem>>, vector<1x8x256xf32>
    %8 = vector.shape_cast %7 : vector<1x8x256xf32> to vector<8x256xf32>
    %9 = vector.shape_cast %6 : vector<8x256xf32> to vector<1x8x256xf32>
    tpu.vector_store %arg5[%c0_6, %c0_7, %c0_8], %9 {strides = array<i32>} : memref<1x8x256xf32, #tpu.memory_space<vmem>>, vector<1x8x256xf32>,
    return
  }
  func.func @transform_0(%arg0: i32, %arg1: i32) -> (i32, i32) {
    %c0_i32 = arith.constant 0 : i32
    %c0_i32_0 = arith.constant 0 : i32
    %c0_i32_1 = arith.constant 0 : i32
    return %c0_i32, %c0_i32_0 : i32, i32
  }
  func.func @transform_1(%arg0: i32, %arg1: i32) -> (i32, i32) {
    %c0_i32 = arith.constant 0 : i32
    %c0_i32_0 = arith.constant 0 : i32
    %c0_i32_1 = arith.constant 0 : i32
    return %c0_i32, %c0_i32_0 : i32, i32
  }
  func.func @transform_2(%arg0: i32, %arg1: i32) -> (i32, i32, i32) {
    %c0_i32 = arith.constant 0 : i32
    %c0_i32_0 = arith.constant 0 : i32
    return %arg0, %c0_i32, %arg1 : i32, i32, i32
  }
  func.func @transform_3(%arg0: i32, %arg1: i32) -> (i32, i32, i32) {
    %c0_i32 = arith.constant 0 : i32
    %c0_i32_0 = arith.constant 0 : i32
    return %arg0, %c0_i32, %arg1 : i32, i32, i32
  }
}

</mosaic_0001>

<bundles_post_ra>
// kernel: abc_2d_agnostic_forward.1
= control target key start
LH: loop header
LB: loop body
LE: loop exit
PB: predicated region body
PF: predicated region fallthrough
CT: control target
= control target key end

     0   :  { %s472_s12 = smov 0   ;;  %s474_s13 = smov 0   ;;  %s511_s0 = inlined_call_operand.vmem [shape: f32[8,16], index: 0, kind: input, shape index: {}]   ;;  %s512_s1 = inlined_call_operand.vmem [shape: f32[8,1], index: 1, kind: input, shape index: {}]   ;;  %s513_s2 = inlined_call_operand.vmem [shape: f32[2,16,256], index: 2, kind: input, shape index: {}]   ;;  %s514_s3 = inlined_call_operand.vmem [shape: f32[2,8,256], index: 3, kind: output, shape index: {}]  }
   0x1   :  { %s476_s14 = smov 0  }
   0x2 LB: > { %s25_s15 = sadd.s32 1, %s444_s13  ;;  %p389_p0 = scmp.ge.s32.totalorder %s448_s14, 1  ;;  %s448_s14 = sphi %s476_s14, %s13_s14   ;;  %s444_s13 = sphi %s474_s13, %s516_s13   ;;  %s440_s12 = sphi %s472_s12, %s515_s12  }
   0x3   : > { %p27_p1 = scmp.ge.s32.totalorder %s25_s15, 2  ;;  %p158_p2 = scmp.lt.s32.totalorder %s448_s14, 3 }
   0x5   : > { %s518_s15 = smov (%p27_p1, %s25_s15), 0  ;;  %p159_p3 = pnand %p389_p0, %p158_p2 }
   0x6   : > { %p191_p4 = scmp.lt.s32.totalorder (!%p159_p3), %s440_s12, 1 }
   0x7   : > { %162 = sbr.rel (%p159_p3) target bundleno = 218 (0xda), region = 32 }
   0xc   : > { %v215_v0 = vld [vmem:[%s512_s1] sm:$0xff]  ;;  %v450_v1 = vmov 0.0   ;;  %v451_v2 = vmov 0   ;;  %s520_s12 = smov (!%p191_p4, %s440_s12), 1  ;;  %vm221_vm0 = vcmask 130048  }
   0xd   : > { %289 = vmatprep.mubr.f32.mxu0 %v450_v1  ;;  %425 = vset.pattern.permute.xlu0 %v451_v2  ;;  %s397_s18 = sshll.u32 %s520_s12, 5  ;;  %v210_v7 = vld [vmem:[%s511_s0] sm:$0xff]  ;;  %s398_s24 = sshll.u32 %s520_s12, 4 }
   0xe   : > { %218 = vperm.xlu0 %425, %v215_v0   ;;  %s198_s21 = scalar_lea.vmem %s513_s2, %s397_s18  ;;  %s208_s27 = scalar_lea.vmem %s514_s3, %s398_s24 }
   0xf   : > { %v214_v3 = vld [vmem:[%s198_s21 + $0x18] sm:$0xff]  ;;  %v213_v4 = vld [vmem:[%s198_s21 + $0x10] sm:$0xff]  ;;  %v212_v5 = vld [vmem:[%s198_s21 + $0x8] sm:$0xff] }
  0x10   : > { %253 = vmatprep.subr.mxu0 %v214_v3  ;;  %v211_v6 = vld [vmem:[%s198_s21] sm:$0xff] }
  0x11   : > { %254 = vmatpush1.msra.mxu0 %v213_v4 }
  0x12   : > { %255 = vmatprep.subr.mxu0 %v212_v5 }
  0x13   : > { %256 = vmatpush1.msra.mxu0 %v211_v6 }
  0x14   : > { %394 = vmatmul.mubr.msk.f32.vlgmr.msra.gmra.mxu0 %vm221_vm0, %v210_v7 }
  0x89   : > { %v219_v8 = vpop.permute.xlu0 %218 }
  0xd4   : > { %v291_v9 = vpop.f32.mrf.mxu0 }
  0xd5   : > { %v292_v10 = vadd.f32 %v291_v9, %v219_v8 }
  0xd6   : > { %v293_v11 = vpop.f32.mrf.mxu0 }
  0xd7   : > { %296 = vst [vmem:[%s208_s27] sm:$0xff] %v292_v10  ;;  %v294_v12 = vadd.f32 %v293_v11, %v219_v8 }
  0xd9   : > { %297 = vst [vmem:[%s208_s27 + $0x8] sm:$0xff] %v294_v12 }
  0xda PF: > { %s13_s14 = sadd.s32 1, %s448_s14   ;;  %s515_s12 = smov %s444_s13 }
  0xdb   : > { %p10_p5 = scmp.ge.s32.totalorder %s13_s14, 4   ;;  %s516_s13 = smov %s518_s15 }
  0xdd   :  { %12 = sbr.rel (!%p10_p5) target bundleno = 2 (0x2), region = 62 }

</bundles_post_ra>
